<compile_context>
chip_gen: v5e
topology: v5e:2x2
jax: 0.10.0
libtpu: 0.0.40
codegen_flags: <defaults>
</compile_context>

<pallas_src>
import functools

import jax
import jax.numpy as jnp
from jax.experimental import pallas as pl
from jax.experimental.pallas import tpu as pltpu


_VMEM = pl.BlockSpec(memory_space=pltpu.MemorySpace.VMEM)


# --------------------------------------------------------------------------
# Kernels
# --------------------------------------------------------------------------
def _lstm_seq_kernel(x_ref, wih_ref, whh_ref, b_ref, wout_ref, bout_ref,
                     h0_ref, c0_ref, out_ref, hN_ref, cN_ref):
    """Full-sequence LSTM + output Linear.  Everything stays in vregs."""
    T = x_ref.shape[0]
    H = h0_ref.shape[1]

    # Recurrent weight stays resident in vregs for the whole sequence.
    whh = whh_ref[...]                                        # (H, 4H)

    # Hoisted input projection + fused (pre-scaled) bias: one (T,D)@(D,4H)
    # matmul, kept as a value (one vreg at T=8, 4H=128).
    xw = (jnp.dot(x_ref[...], wih_ref[...],
                  preferred_element_type=jnp.float32)
          + b_ref[...])                                       # (T, 4H)

    h = h0_ref[...]                                           # (1, H)
    c = c0_ref[...]                                           # (1, H)
    hs = []
    # T is static & tiny -> straight-line unrolled body (static slices of xw).
    for t in range(T):
        # Only matmul on the serial h->h critical path.
        gates = xw[t:t + 1, :] + jnp.dot(
            h, whh, preferred_element_type=jnp.float32)       # (1, 4H)
        # Single EUP push: tanh over all 4H lanes.  i/f/o columns were
        # pre-scaled by 0.5, so sigmoid(orig) = 0.5*tanh + 0.5 (one VPU FMA).
        tnh = jnp.tanh(gates)
        sig = 0.5 * tnh + 0.5
        i_g = sig[:, 0:H]
        f_g = sig[:, H:2 * H]
        g_g = tnh[:, 2 * H:3 * H]                             # unscaled -> tanh(g)
        o_g = sig[:, 3 * H:4 * H]
        c = f_g * c + i_g * g_g
        h = o_g * jnp.tanh(c)
        hs.append(h)

    hN_ref[...] = h
    cN_ref[...] = c

    # Batched output projection after the recurrence (nn.Linear).
    h_all = jnp.concatenate(hs, axis=0)                       # (T, H)
    out_ref[...] = (jnp.dot(h_all, wout_ref[...],
                            preferred_element_type=jnp.float32)
                    + bout_ref[...])


def _predict_future_kernel(x_ref, wih_ref, whh_ref, b_ref, wout_ref, bout_ref,
                           h0_ref, c0_ref, out_ref, hN_ref, cN_ref, *, steps):
    """Fused autoregressive rollout: `steps` full forward passes in one call."""
    H = h0_ref.shape[1]

    wih = wih_ref[...]                                        # (D, 4H)
    whh = whh_ref[...]                                        # (H, 4H)
    b = b_ref[...]                                            # (1, 4H)
    wout = wout_ref[...]                                      # (H, D)
    bout = bout_ref[...]                                      # (1, D)

    x = x_ref[...]                                            # (1, D)
    h = h0_ref[...]
    c = c0_ref[...]
    outs = []
    for _ in range(steps):
        gates = (jnp.dot(x, wih, preferred_element_type=jnp.float32) + b
                 + jnp.dot(h, whh, preferred_element_type=jnp.float32))
        tnh = jnp.tanh(gates)
        sig = 0.5 * tnh + 0.5
        i_g = sig[:, 0:H]
        f_g = sig[:, H:2 * H]
        g_g = tnh[:, 2 * H:3 * H]
        o_g = sig[:, 3 * H:4 * H]
        c = f_g * c + i_g * g_g
        h = o_g * jnp.tanh(c)
        # Output layer feeds back as the next input.
        x = jnp.dot(h, wout, preferred_element_type=jnp.float32) + bout
        outs.append(x)

    out_ref[...] = jnp.concatenate(outs, axis=0)              # (steps, D)
    hN_ref[...] = h
    cN_ref[...] = c


# --------------------------------------------------------------------------
# Parameters
# --------------------------------------------------------------------------
def init_params(key, hidden_dim, input_dim):
    """Deterministic synthetic parameters matching nn.LSTM / nn.Linear shapes."""
    H, D = hidden_dim, input_dim
    k = 1.0 / jnp.sqrt(jnp.float32(H))
    keys = jax.random.split(key, 6)
    u = lambda kk, shape: jax.random.uniform(kk, shape, jnp.float32, -k, k)
    return {
        "w_ih": u(keys[0], (4 * H, D)),   # PyTorch weight_ih_l0  (gate order i,f,g,o)
        "w_hh": u(keys[1], (4 * H, H)),   # PyTorch weight_hh_l0
        "b_ih": u(keys[2], (4 * H,)),
        "b_hh": u(keys[3], (4 * H,)),
        "w_out": u(keys[4], (D, H)),      # nn.Linear weight
        "b_out": u(keys[5], (D,)),
    }


def prepare_params(raw):
    """Pre-transpose / pre-fuse parameters ONCE (cached pytree).

    Also folds the 0.5 input scale of sigmoid(x) = 0.5*tanh(x/2) + 0.5 into
    the i/f/o gate columns so the kernel needs a single tanh per step.
    """
    H = raw["w_hh"].shape[1]
    D = raw["w_ih"].shape[1]

    wih_t = raw["w_ih"].T.astype(jnp.float32)                      # (D, 4H)
    whh_t = raw["w_hh"].T.astype(jnp.float32)                      # (H, 4H)
    bias = (raw["b_ih"] + raw["b_hh"]).reshape(1, 4 * H).astype(jnp.float32)

    # Gate columns [i | f | g | o]: halve i/f/o, leave g untouched.
    scale = jnp.concatenate(
        [jnp.full((1, H), 0.5), jnp.full((1, H), 0.5),
         jnp.ones((1, H)), jnp.full((1, H), 0.5)],
        axis=1).astype(jnp.float32)                                # (1, 4H)

    return {
        "wih_t": wih_t * scale,
        "whh_t": whh_t * scale,
        "bias": bias * scale,
        "wout_t": raw["w_out"].T.astype(jnp.float32),              # (H, D)
        "bout": raw["b_out"].reshape(1, D).astype(jnp.float32),    # (1, D)
    }


# --------------------------------------------------------------------------
# Wrappers
# --------------------------------------------------------------------------
def _forward_cost(T, D, H):
    return pl.CostEstimate(
        flops=(2 * T * D * 4 * H          # hoisted input projection
               + 2 * T * H * 4 * H        # per-step recurrent matmul
               + 2 * T * H * D            # batched output projection
               + 12 * T * H),             # gate / state elementwise math
        transcendentals=T * (4 * H + H),  # one tanh(4H) + tanh(H) per step
        bytes_accessed=4 * (T * D + D * 4 * H + H * 4 * H + 4 * H
                            + H * D + D + 2 * H            # inputs
                            + T * D + 2 * H),              # outputs
    )


@jax.jit
def _forward_pallas(prepared, x, h0, c0):
    T, D = x.shape
    H = h0.shape[1]
    return pl.pallas_call(
        _lstm_seq_kernel,
        out_shape=(
            jax.ShapeDtypeStruct((T, D), jnp.float32),
            jax.ShapeDtypeStruct((1, H), jnp.float32),
            jax.ShapeDtypeStruct((1, H), jnp.float32),
        ),
        in_specs=[_VMEM] * 8,
        out_specs=(_VMEM, _VMEM, _VMEM),
        compiler_params=pltpu.CompilerParams(
            vmem_limit_bytes=4 * 1024 * 1024,   # ~100 KiB used; ample headroom
        ),
        cost_estimate=_forward_cost(T, D, H),
    )(x, prepared["wih_t"], prepared["whh_t"], prepared["bias"],
      prepared["wout_t"], prepared["bout"], h0, c0)


def unemployment_lstm_forward(prepared, x, hidden=None):
    """Forward pass of UnemploymentLstm.  x: (seq_len, input_dim) float32."""
    H = prepared["whh_t"].shape[0]
    if hidden is None:
        h0 = jnp.zeros((1, H), jnp.float32)
        c0 = jnp.zeros((1, H), jnp.float32)
    else:
        h0 = hidden[0].reshape(1, H).astype(jnp.float32)
        c0 = hidden[1].reshape(1, H).astype(jnp.float32)

    out, h_n, c_n = _forward_pallas(prepared, x.astype(jnp.float32), h0, c0)
    if hidden is None:
        return out
    return out, (h_n, c_n)


@functools.partial(jax.jit, static_argnames=("steps",))
def _predict_future_pallas(prepared, x0, h0, c0, *, steps):
    D = x0.shape[1]
    H = h0.shape[1]
    kernel = functools.partial(_predict_future_kernel, steps=steps)
    cost = pl.CostEstimate(
        flops=steps * (2 * D * 4 * H + 2 * H * 4 * H + 2 * H * D + 12 * H),
        transcendentals=steps * (4 * H + H),
        bytes_accessed=4 * (D + D * 4 * H + H * 4 * H + 4 * H + H * D + D
                            + 2 * H + steps * D + 2 * H),
    )
    return pl.pallas_call(
        kernel,
        out_shape=(
            jax.ShapeDtypeStruct((steps, D), jnp.float32),
            jax.ShapeDtypeStruct((1, H), jnp.float32),
            jax.ShapeDtypeStruct((1, H), jnp.float32),
        ),
        in_specs=[_VMEM] * 8,
        out_specs=(_VMEM, _VMEM, _VMEM),
        compiler_params=pltpu.CompilerParams(
            vmem_limit_bytes=4 * 1024 * 1024,
        ),
        cost_estimate=cost,
    )(x0, prepared["wih_t"], prepared["whh_t"], prepared["bias"],
      prepared["wout_t"], prepared["bout"], h0, c0)


def predict_future(prepared, steps, x, hidden=None):
    """Fused autoregressive rollout (all `steps` forwards in ONE pallas_call).

    Returns (outputs (steps, input_dim), (h_n, c_n)).  Equivalent to
    torch.stack(list(model.predict_future(steps, x, hidden))).
    """
    D = prepared["wout_t"].shape[1]
    H = prepared["whh_t"].shape[0]
    x0 = x.reshape(1, D).astype(jnp.float32)
    if hidden is None:
        h0 = jnp.zeros((1, H), jnp.float32)
        c0 = jnp.zeros((1, H), jnp.float32)
    else:
        h0 = hidden[0].reshape(1, H).astype(jnp.float32)
        c0 = hidden[1].reshape(1, H).astype(jnp.float32)
    outs, h_n, c_n = _predict_future_pallas(prepared, x0, h0, c0, steps=steps)
    return outs, (h_n, c_n)


# --------------------------------------------------------------------------
# Pure-JAX references (PyTorch math, raw params) for correctness checks
# --------------------------------------------------------------------------
def _reference_forward(params, x, hidden=None):
    T, D = x.shape
    H = params["w_hh"].shape[1]
    if hidden is None:
        h = jnp.zeros((1, H), jnp.float32)
        c = jnp.zeros((1, H), jnp.float32)
    else:
        h, c = hidden[0].reshape(1, H), hidden[1].reshape(1, H)
    b = (params["b_ih"] + params["b_hh"]).reshape(1, 4 * H)
    outs = []
    for t in range(T):
        x_t = x[t:t + 1]
        gates = x_t @ params["w_ih"].T + h @ params["w_hh"].T + b
        i = jax.nn.sigmoid(gates[:, 0:H])
        f = jax.nn.sigmoid(gates[:, H:2 * H])
        g = jnp.tanh(gates[:, 2 * H:3 * H])
        o = jax.nn.sigmoid(gates[:, 3 * H:4 * H])
        c = f * c + i * g
        h = o * jnp.tanh(c)
        outs.append(h @ params["w_out"].T + params["b_out"].reshape(1, D))
    result = jnp.concatenate(outs, axis=0)
    if hidden is None:
        return result
    return result, (h, c)


def _reference_predict_future(params, steps, x, hidden=None):
    last = x.reshape(1, -1)
    state = hidden
    if state is None:
        H = params["w_hh"].shape[1]
        state = (jnp.zeros((1, H), jnp.float32), jnp.zeros((1, H), jnp.float32))
    outs = []
    for _ in range(steps):
        last, state = _reference_forward(params, last, state)
        outs.append(last[0])
    return jnp.stack(outs), state


# --------------------------------------------------------------------------
if __name__ == "__main__":
    hidden_dim = 32
    input_dim = 4      # UNEMPLOYMENT + 3 extra input features
    seq_len = 8
    steps = 12

    key = jax.random.PRNGKey(0)
    pkey, xkey, hkey, ckey, fkey = jax.random.split(key, 5)
    raw_params = init_params(pkey, hidden_dim, input_dim)
    prepared = prepare_params(raw_params)   # transposes / bias fuse done ONCE

    x = jax.random.normal(xkey, (seq_len, input_dim), jnp.float32)
    h0 = jax.random.normal(hkey, (1, hidden_dim), jnp.float32)
    c0 = jax.random.normal(ckey, (1, hidden_dim), jnp.float32)
    x_future = jax.random.normal(fkey, (input_dim,), jnp.float32)

    # Path 1: hidden=None -> returns only result (seq_len, input_dim)
    out = unemployment_lstm_forward(prepared, x)
    out = jax.block_until_ready(out)

    # Path 2: explicit hidden -> returns (result, (h_n, c_n))
    out_h, (h_n, c_n) = unemployment_lstm_forward(prepared, x, (h0, c0))
    jax.block_until_ready((out_h, h_n, c_n))

    # Path 3: fused autoregressive rollout (predict_future) in one pallas_call
    preds, (h_f, c_f) = predict_future(prepared, steps, x_future, (h0, c0))
    jax.block_until_ready((preds, h_f, c_f))

    # Correctness checks vs. pure-JAX reference of the PyTorch math.
    ref = _reference_forward(raw_params, x)
    ref_h, (ref_hn, ref_cn) = _reference_forward(raw_params, x, (h0, c0))
    ref_p, (ref_hf, ref_cf) = _reference_predict_future(
        raw_params, steps, x_future, (h0, c0))

    assert jnp.allclose(out, ref, atol=1e-5, rtol=1e-5)
    assert jnp.allclose(out_h, ref_h, atol=1e-5, rtol=1e-5)
    assert jnp.allclose(h_n, ref_hn, atol=1e-5, rtol=1e-5)
    assert jnp.allclose(c_n, ref_cn, atol=1e-5, rtol=1e-5)
    # Rollout feeds outputs back as inputs -> slightly looser tolerance.
    assert jnp.allclose(preds, ref_p, atol=1e-4, rtol=1e-4)
    assert jnp.allclose(h_f, ref_hf, atol=1e-4, rtol=1e-4)
    assert jnp.allclose(c_f, ref_cf, atol=1e-4, rtol=1e-4)

    print("KERNEL_OK")
</pallas_src>

<mosaic_0001>
module attributes {stable_mosaic.version = 11 : i64} {
  func.func @_lstm_seq_kernel(%arg0: memref<8x4xf32, #tpu.memory_space<vmem>>, %arg1: memref<4x128xf32, #tpu.memory_space<vmem>>, %arg2: memref<32x128xf32, #tpu.memory_space<vmem>>, %arg3: memref<1x128xf32, #tpu.memory_space<vmem>>, %arg4: memref<32x4xf32, #tpu.memory_space<vmem>>, %arg5: memref<1x4xf32, #tpu.memory_space<vmem>>, %arg6: memref<1x32xf32, #tpu.memory_space<vmem>>, %arg7: memref<1x32xf32, #tpu.memory_space<vmem>>, %arg8: memref<8x4xf32, #tpu.memory_space<vmem>>, %arg9: memref<1x32xf32, #tpu.memory_space<vmem>>, %arg10: memref<1x32xf32, #tpu.memory_space<vmem>>) attributes {dimension_semantics = [], scalar_prefetch = 0 : i64, scratch_operands = 0 : i64, tpu.core_type = #tpu.core_type<tc>} {
    %c0 = arith.constant 0 : index
    %c0_0 = arith.constant 0 : index
    %0 = vector.load %arg2[%c0, %c0_0] : memref<32x128xf32, #tpu.memory_space<vmem>>, vector<32x128xf32>
    %c0_1 = arith.constant 0 : index
    %c0_2 = arith.constant 0 : index
    %1 = vector.load %arg0[%c0_1, %c0_2] : memref<8x4xf32, #tpu.memory_space<vmem>>, vector<8x4xf32>
    %c0_3 = arith.constant 0 : index
    %c0_4 = arith.constant 0 : index
    %2 = vector.load %arg1[%c0_3, %c0_4] : memref<4x128xf32, #tpu.memory_space<vmem>>, vector<4x128xf32>
    %cst = arith.constant dense<0.000000e+00> : vector<8x128xf32>
    %3 = tpu.matmul %1, %2, %cst {dimension_numbers = #tpu.dot_dimension_numbers<[1], [0], [0], [1], [0, 0, 1, 1], [], []>} : vector<8x4xf32>, vector<4x128xf32>, vector<8x128xf32> -> vector<8x128xf32>
    %c0_5 = arith.constant 0 : index
    %c0_6 = arith.constant 0 : index
    %4 = vector.load %arg3[%c0_5, %c0_6] : memref<1x128xf32, #tpu.memory_space<vmem>>, vector<1x128xf32>
    %5 = vector.broadcast %4 : vector<1x128xf32> to vector<8x128xf32>
    %6 = arith.addf %3, %5 : vector<8x128xf32>
    %c0_7 = arith.constant 0 : index
    %c0_8 = arith.constant 0 : index
    %7 = vector.load %arg6[%c0_7, %c0_8] : memref<1x32xf32, #tpu.memory_space<vmem>>, vector<1x32xf32>
    %c0_9 = arith.constant 0 : index
    %c0_10 = arith.constant 0 : index
    %8 = vector.load %arg7[%c0_9, %c0_10] : memref<1x32xf32, #tpu.memory_space<vmem>>, vector<1x32xf32>
    %9 = vector.extract_strided_slice %6 {offsets = [0, 0], sizes = [1, 128], strides = [1, 1]} : vector<8x128xf32> to vector<1x128xf32>
    %cst_11 = arith.constant dense<0.000000e+00> : vector<1x128xf32>
    %10 = tpu.matmul %7, %0, %cst_11 {dimension_numbers = #tpu.dot_dimension_numbers<[1], [0], [0], [1], [0, 0, 1, 1], [], []>} : vector<1x32xf32>, vector<32x128xf32>, vector<1x128xf32> -> vector<1x128xf32>
    %11 = arith.addf %9, %10 : vector<1x128xf32>
    %12 = math.tanh %11 : vector<1x128xf32>
    %cst_12 = arith.constant 5.000000e-01 : f32
    %13 = vector.broadcast %cst_12 : f32 to vector<1x128xf32>
    %14 = arith.mulf %13, %12 : vector<1x128xf32>
    %cst_13 = arith.constant 5.000000e-01 : f32
    %15 = vector.broadcast %cst_13 : f32 to vector<1x128xf32>
    %16 = arith.addf %14, %15 : vector<1x128xf32>
    %17 = vector.extract_strided_slice %16 {offsets = [0, 0], sizes = [1, 32], strides = [1, 1]} : vector<1x128xf32> to vector<1x32xf32>
    %18 = vector.extract_strided_slice %16 {offsets = [0, 32], sizes = [1, 32], strides = [1, 1]} : vector<1x128xf32> to vector<1x32xf32>
    %19 = vector.extract_strided_slice %12 {offsets = [0, 64], sizes = [1, 32], strides = [1, 1]} : vector<1x128xf32> to vector<1x32xf32>
    %20 = vector.extract_strided_slice %16 {offsets = [0, 96], sizes = [1, 32], strides = [1, 1]} : vector<1x128xf32> to vector<1x32xf32>
    %21 = arith.mulf %18, %8 : vector<1x32xf32>
    %22 = arith.mulf %17, %19 : vector<1x32xf32>
    %23 = arith.addf %21, %22 : vector<1x32xf32>
    %24 = math.tanh %23 : vector<1x32xf32>
    %25 = arith.mulf %20, %24 : vector<1x32xf32>
    %26 = vector.extract_strided_slice %6 {offsets = [1, 0], sizes = [1, 128], strides = [1, 1]} : vector<8x128xf32> to vector<1x128xf32>
    %cst_14 = arith.constant dense<0.000000e+00> : vector<1x128xf32>
    %27 = tpu.matmul %25, %0, %cst_14 {dimension_numbers = #tpu.dot_dimension_numbers<[1], [0], [0], [1], [0, 0, 1, 1], [], []>} : vector<1x32xf32>, vector<32x128xf32>, vector<1x128xf32> -> vector<1x128xf32>
    %28 = arith.addf %26, %27 : vector<1x128xf32>
    %29 = math.tanh %28 : vector<1x128xf32>
    %cst_15 = arith.constant 5.000000e-01 : f32
    %30 = vector.broadcast %cst_15 : f32 to vector<1x128xf32>
    %31 = arith.mulf %30, %29 : vector<1x128xf32>
    %cst_16 = arith.constant 5.000000e-01 : f32
    %32 = vector.broadcast %cst_16 : f32 to vector<1x128xf32>
    %33 = arith.addf %31, %32 : vector<1x128xf32>
    %34 = vector.extract_strided_slice %33 {offsets = [0, 0], sizes = [1, 32], strides = [1, 1]} : vector<1x128xf32> to vector<1x32xf32>
    %35 = vector.extract_strided_slice %33 {offsets = [0, 32], sizes = [1, 32], strides = [1, 1]} : vector<1x128xf32> to vector<1x32xf32>
    %36 = vector.extract_strided_slice %29 {offsets = [0, 64], sizes = [1, 32], strides = [1, 1]} : vector<1x128xf32> to vector<1x32xf32>
    %37 = vector.extract_strided_slice %33 {offsets = [0, 96], sizes = [1, 32], strides = [1, 1]} : vector<1x128xf32> to vector<1x32xf32>
    %38 = arith.mulf %35, %23 : vector<1x32xf32>
    %39 = arith.mulf %34, %36 : vector<1x32xf32>
    %40 = arith.addf %38, %39 : vector<1x32xf32>
    %41 = math.tanh %40 : vector<1x32xf32>
    %42 = arith.mulf %37, %41 : vector<1x32xf32>
    %43 = vector.extract_strided_slice %6 {offsets = [2, 0], sizes = [1, 128], strides = [1, 1]} : vector<8x128xf32> to vector<1x128xf32>
    %cst_17 = arith.constant dense<0.000000e+00> : vector<1x128xf32>
    %44 = tpu.matmul %42, %0, %cst_17 {dimension_numbers = #tpu.dot_dimension_numbers<[1], [0], [0], [1], [0, 0, 1, 1], [], []>} : vector<1x32xf32>, vector<32x128xf32>, vector<1x128xf32> -> vector<1x128xf32>
    %45 = arith.addf %43, %44 : vector<1x128xf32>
    %46 = math.tanh %45 : vector<1x128xf32>
    %cst_18 = arith.constant 5.000000e-01 : f32
    %47 = vector.broadcast %cst_18 : f32 to vector<1x128xf32>
    %48 = arith.mulf %47, %46 : vector<1x128xf32>
    %cst_19 = arith.constant 5.000000e-01 : f32
    %49 = vector.broadcast %cst_19 : f32 to vector<1x128xf32>
    %50 = arith.addf %48, %49 : vector<1x128xf32>
    %51 = vector.extract_strided_slice %50 {offsets = [0, 0], sizes = [1, 32], strides = [1, 1]} : vector<1x128xf32> to vector<1x32xf32>
    %52 = vector.extract_strided_slice %50 {offsets = [0, 32], sizes = [1, 32], strides = [1, 1]} : vector<1x128xf32> to vector<1x32xf32>
    %53 = vector.extract_strided_slice %46 {offsets = [0, 64], sizes = [1, 32], strides = [1, 1]} : vector<1x128xf32> to vector<1x32xf32>
    %54 = vector.extract_strided_slice %50 {offsets = [0, 96], sizes = [1, 32], strides = [1, 1]} : vector<1x128xf32> to vector<1x32xf32>
    %55 = arith.mulf %52, %40 : vector<1x32xf32>
    %56 = arith.mulf %51, %53 : vector<1x32xf32>
    %57 = arith.addf %55, %56 : vector<1x32xf32>
    %58 = math.tanh %57 : vector<1x32xf32>
    %59 = arith.mulf %54, %58 : vector<1x32xf32>
    %60 = vector.extract_strided_slice %6 {offsets = [3, 0], sizes = [1, 128], strides = [1, 1]} : vector<8x128xf32> to vector<1x128xf32>
    %cst_20 = arith.constant dense<0.000000e+00> : vector<1x128xf32>
    %61 = tpu.matmul %59, %0, %cst_20 {dimension_numbers = #tpu.dot_dimension_numbers<[1], [0], [0], [1], [0, 0, 1, 1], [], []>} : vector<1x32xf32>, vector<32x128xf32>, vector<1x128xf32> -> vector<1x128xf32>
    %62 = arith.addf %60, %61 : vector<1x128xf32>
    %63 = math.tanh %62 : vector<1x128xf32>
    %cst_21 = arith.constant 5.000000e-01 : f32
    %64 = vector.broadcast %cst_21 : f32 to vector<1x128xf32>
    %65 = arith.mulf %64, %63 : vector<1x128xf32>
    %cst_22 = arith.constant 5.000000e-01 : f32
    %66 = vector.broadcast %cst_22 : f32 to vector<1x128xf32>
    %67 = arith.addf %65, %66 : vector<1x128xf32>
    %68 = vector.extract_strided_slice %67 {offsets = [0, 0], sizes = [1, 32], strides = [1, 1]} : vector<1x128xf32> to vector<1x32xf32>
    %69 = vector.extract_strided_slice %67 {offsets = [0, 32], sizes = [1, 32], strides = [1, 1]} : vector<1x128xf32> to vector<1x32xf32>
    %70 = vector.extract_strided_slice %63 {offsets = [0, 64], sizes = [1, 32], strides = [1, 1]} : vector<1x128xf32> to vector<1x32xf32>
    %71 = vector.extract_strided_slice %67 {offsets = [0, 96], sizes = [1, 32], strides = [1, 1]} : vector<1x128xf32> to vector<1x32xf32>
    %72 = arith.mulf %69, %57 : vector<1x32xf32>
    %73 = arith.mulf %68, %70 : vector<1x32xf32>
    %74 = arith.addf %72, %73 : vector<1x32xf32>
    %75 = math.tanh %74 : vector<1x32xf32>
    %76 = arith.mulf %71, %75 : vector<1x32xf32>
    %77 = vector.extract_strided_slice %6 {offsets = [4, 0], sizes = [1, 128], strides = [1, 1]} : vector<8x128xf32> to vector<1x128xf32>
    %cst_23 = arith.constant dense<0.000000e+00> : vector<1x128xf32>
    %78 = tpu.matmul %76, %0, %cst_23 {dimension_numbers = #tpu.dot_dimension_numbers<[1], [0], [0], [1], [0, 0, 1, 1], [], []>} : vector<1x32xf32>, vector<32x128xf32>, vector<1x128xf32> -> vector<1x128xf32>
    %79 = arith.addf %77, %78 : vector<1x128xf32>
    %80 = math.tanh %79 : vector<1x128xf32>
    %cst_24 = arith.constant 5.000000e-01 : f32
    %81 = vector.broadcast %cst_24 : f32 to vector<1x128xf32>
    %82 = arith.mulf %81, %80 : vector<1x128xf32>
    %cst_25 = arith.constant 5.000000e-01 : f32
    %83 = vector.broadcast %cst_25 : f32 to vector<1x128xf32>
    %84 = arith.addf %82, %83 : vector<1x128xf32>
    %85 = vector.extract_strided_slice %84 {offsets = [0, 0], sizes = [1, 32], strides = [1, 1]} : vector<1x128xf32> to vector<1x32xf32>
    %86 = vector.extract_strided_slice %84 {offsets = [0, 32], sizes = [1, 32], strides = [1, 1]} : vector<1x128xf32> to vector<1x32xf32>
    %87 = vector.extract_strided_slice %80 {offsets = [0, 64], sizes = [1, 32], strides = [1, 1]} : vector<1x128xf32> to vector<1x32xf32>
    %88 = vector.extract_strided_slice %84 {offsets = [0, 96], sizes = [1, 32], strides = [1, 1]} : vector<1x128xf32> to vector<1x32xf32>
    %89 = arith.mulf %86, %74 : vector<1x32xf32>
    %90 = arith.mulf %85, %87 : vector<1x32xf32>
    %91 = arith.addf %89, %90 : vector<1x32xf32>
    %92 = math.tanh %91 : vector<1x32xf32>
    %93 = arith.mulf %88, %92 : vector<1x32xf32>
    %94 = vector.extract_strided_slice %6 {offsets = [5, 0], sizes = [1, 128], strides = [1, 1]} : vector<8x128xf32> to vector<1x128xf32>
    %cst_26 = arith.constant dense<0.000000e+00> : vector<1x128xf32>
    %95 = tpu.matmul %93, %0, %cst_26 {dimension_numbers = #tpu.dot_dimension_numbers<[1], [0], [0], [1], [0, 0, 1, 1], [], []>} : vector<1x32xf32>, vector<32x128xf32>, vector<1x128xf32> -> vector<1x128xf32>
    %96 = arith.addf %94, %95 : vector<1x128xf32>
    %97 = math.tanh %96 : vector<1x128xf32>
    %cst_27 = arith.constant 5.000000e-01 : f32
    %98 = vector.broadcast %cst_27 : f32 to vector<1x128xf32>
    %99 = arith.mulf %98, %97 : vector<1x128xf32>
    %cst_28 = arith.constant 5.000000e-01 : f32
    %100 = vector.broadcast %cst_28 : f32 to vector<1x128xf32>
    %101 = arith.addf %99, %100 : vector<1x128xf32>
    %102 = vector.extract_strided_slice %101 {offsets = [0, 0], sizes = [1, 32], strides = [1, 1]} : vector<1x128xf32> to vector<1x32xf32>
    %103 = vector.extract_strided_slice %101 {offsets = [0, 32], sizes = [1, 32], strides = [1, 1]} : vector<1x128xf32> to vector<1x32xf32>
    %104 = vector.extract_strided_slice %97 {offsets = [0, 64], sizes = [1, 32], strides = [1, 1]} : vector<1x128xf32> to vector<1x32xf32>
    %105 = vector.extract_strided_slice %101 {offsets = [0, 96], sizes = [1, 32], strides = [1, 1]} : vector<1x128xf32> to vector<1x32xf32>
    %106 = arith.mulf %103, %91 : vector<1x32xf32>
    %107 = arith.mulf %102, %104 : vector<1x32xf32>
    %108 = arith.addf %106, %107 : vector<1x32xf32>
    %109 = math.tanh %108 : vector<1x32xf32>
    %110 = arith.mulf %105, %109 : vector<1x32xf32>
    %111 = vector.extract_strided_slice %6 {offsets = [6, 0], sizes = [1, 128], strides = [1, 1]} : vector<8x128xf32> to vector<1x128xf32>
    %cst_29 = arith.constant dense<0.000000e+00> : vector<1x128xf32>
    %112 = tpu.matmul %110, %0, %cst_29 {dimension_numbers = #tpu.dot_dimension_numbers<[1], [0], [0], [1], [0, 0, 1, 1], [], []>} : vector<1x32xf32>, vector<32x128xf32>, vector<1x128xf32> -> vector<1x128xf32>
    %113 = arith.addf %111, %112 : vector<1x128xf32>
    %114 = math.tanh %113 : vector<1x128xf32>
    %cst_30 = arith.constant 5.000000e-01 : f32
    %115 = vector.broadcast %cst_30 : f32 to vector<1x128xf32>
    %116 = arith.mulf %115, %114 : vector<1x128xf32>
    %cst_31 = arith.constant 5.000000e-01 : f32
    %117 = vector.broadcast %cst_31 : f32 to vector<1x128xf32>
    %118 = arith.addf %116, %117 : vector<1x128xf32>
    %119 = vector.extract_strided_slice %118 {offsets = [0, 0], sizes = [1, 32], strides = [1, 1]} : vector<1x128xf32> to vector<1x32xf32>
    %120 = vector.extract_strided_slice %118 {offsets = [0, 32], sizes = [1, 32], strides = [1, 1]} : vector<1x128xf32> to vector<1x32xf32>
    %121 = vector.extract_strided_slice %114 {offsets = [0, 64], sizes = [1, 32], strides = [1, 1]} : vector<1x128xf32> to vector<1x32xf32>
    %122 = vector.extract_strided_slice %118 {offsets = [0, 96], sizes = [1, 32], strides = [1, 1]} : vector<1x128xf32> to vector<1x32xf32>
    %123 = arith.mulf %120, %108 : vector<1x32xf32>
    %124 = arith.mulf %119, %121 : vector<1x32xf32>
    %125 = arith.addf %123, %124 : vector<1x32xf32>
    %126 = math.tanh %125 : vector<1x32xf32>
    %127 = arith.mulf %122, %126 : vector<1x32xf32>
    %128 = vector.extract_strided_slice %6 {offsets = [7, 0], sizes = [1, 128], strides = [1, 1]} : vector<8x128xf32> to vector<1x128xf32>
    %cst_32 = arith.constant dense<0.000000e+00> : vector<1x128xf32>
    %129 = tpu.matmul %127, %0, %cst_32 {dimension_numbers = #tpu.dot_dimension_numbers<[1], [0], [0], [1], [0, 0, 1, 1], [], []>} : vector<1x32xf32>, vector<32x128xf32>, vector<1x128xf32> -> vector<1x128xf32>
    %130 = arith.addf %128, %129 : vector<1x128xf32>
    %131 = math.tanh %130 : vector<1x128xf32>
    %cst_33 = arith.constant 5.000000e-01 : f32
    %132 = vector.broadcast %cst_33 : f32 to vector<1x128xf32>
    %133 = arith.mulf %132, %131 : vector<1x128xf32>
    %cst_34 = arith.constant 5.000000e-01 : f32
    %134 = vector.broadcast %cst_34 : f32 to vector<1x128xf32>
    %135 = arith.addf %133, %134 : vector<1x128xf32>
    %136 = vector.extract_strided_slice %135 {offsets = [0, 0], sizes = [1, 32], strides = [1, 1]} : vector<1x128xf32> to vector<1x32xf32>
    %137 = vector.extract_strided_slice %135 {offsets = [0, 32], sizes = [1, 32], strides = [1, 1]} : vector<1x128xf32> to vector<1x32xf32>
    %138 = vector.extract_strided_slice %131 {offsets = [0, 64], sizes = [1, 32], strides = [1, 1]} : vector<1x128xf32> to vector<1x32xf32>
    %139 = vector.extract_strided_slice %135 {offsets = [0, 96], sizes = [1, 32], strides = [1, 1]} : vector<1x128xf32> to vector<1x32xf32>
    %140 = arith.mulf %137, %125 : vector<1x32xf32>
    %141 = arith.mulf %136, %138 : vector<1x32xf32>
    %142 = arith.addf %140, %141 : vector<1x32xf32>
    %143 = math.tanh %142 : vector<1x32xf32>
    %144 = arith.mulf %139, %143 : vector<1x32xf32>
    %c0_35 = arith.constant 0 : index
    %c0_36 = arith.constant 0 : index
    %145 = vector.load %arg9[%c0_35, %c0_36] : memref<1x32xf32, #tpu.memory_space<vmem>>, vector<1x32xf32>
    tpu.vector_store %arg9[%c0_35, %c0_36], %144 {strides = array<i32>} : memref<1x32xf32, #tpu.memory_space<vmem>>, vector<1x32xf32>,
    %c0_37 = arith.constant 0 : index
    %c0_38 = arith.constant 0 : index
    %146 = vector.load %arg10[%c0_37, %c0_38] : memref<1x32xf32, #tpu.memory_space<vmem>>, vector<1x32xf32>
    tpu.vector_store %arg10[%c0_37, %c0_38], %142 {strides = array<i32>} : memref<1x32xf32, #tpu.memory_space<vmem>>, vector<1x32xf32>,
    %147 = tpu.concatenate %25, %42, %59, %76, %93, %110, %127, %144 in 0 : vector<1x32xf32>, vector<1x32xf32>, vector<1x32xf32>, vector<1x32xf32>, vector<1x32xf32>, vector<1x32xf32>, vector<1x32xf32>, vector<1x32xf32> -> vector<8x32xf32>
    %c0_39 = arith.constant 0 : index
    %c0_40 = arith.constant 0 : index
    %148 = vector.load %arg4[%c0_39, %c0_40] : memref<32x4xf32, #tpu.memory_space<vmem>>, vector<32x4xf32>
    %cst_41 = arith.constant dense<0.000000e+00> : vector<8x4xf32>
    %149 = tpu.matmul %147, %148, %cst_41 {dimension_numbers = #tpu.dot_dimension_numbers<[1], [0], [0], [1], [0, 0, 1, 1], [], []>} : vector<8x32xf32>, vector<32x4xf32>, vector<8x4xf32> -> vector<8x4xf32>
    %c0_42 = arith.constant 0 : index
    %c0_43 = arith.constant 0 : index
    %150 = vector.load %arg5[%c0_42, %c0_43] : memref<1x4xf32, #tpu.memory_space<vmem>>, vector<1x4xf32>
    %151 = vector.broadcast %150 : vector<1x4xf32> to vector<8x4xf32>
    %152 = arith.addf %149, %151 : vector<8x4xf32>
    %c0_44 = arith.constant 0 : index
    %c0_45 = arith.constant 0 : index
    %153 = vector.load %arg8[%c0_44, %c0_45] : memref<8x4xf32, #tpu.memory_space<vmem>>, vector<8x4xf32>
    tpu.vector_store %arg8[%c0_44, %c0_45], %152 {strides = array<i32>} : memref<8x4xf32, #tpu.memory_space<vmem>>, vector<8x4xf32>,
    return
  }
}

</mosaic_0001>

<bundles_post_ra>
// kernel: _forward_pallas.1
= control target key start
LH: loop header
LB: loop body
LE: loop exit
PB: predicated region body
PF: predicated region fallthrough
CT: control target
= control target key end

     0   :  { %16 = vsyncpa [#allocation3], 0  ;;  %vm48_vm0 = vcmask 1043456   ;;  %vm44_vm1 = vcmask 31744   ;;  %s861_s0 = inlined_call_operand.vmem [shape: f32[8,4], index: 0, kind: input, shape index: {}]   ;;  %s862_s1 = inlined_call_operand.vmem [shape: f32[4,128], index: 1, kind: input, shape index: {}]   ;;  %s863_s2 = inlined_call_operand.vmem [shape: f32[32,128], index: 2, kind: input, shape index: {}]   ;;  %s864_s3 = inlined_call_operand.vmem [shape: f32[1,128], index: 3, kind: input, shape index: {}]   ;;  %s865_s4 = inlined_call_operand.vmem [shape: f32[32,4], index: 4, kind: input, shape index: {}]   ;;  %s866_s5 = inlined_call_operand.vmem [shape: f32[1,4], index: 5, kind: input, shape index: {}]   ;;  %s867_s6 = inlined_call_operand.vmem [shape: f32[1,32], index: 6, kind: input, shape index: {}]   ;;  %s868_s7 = inlined_call_operand.vmem [shape: f32[1,32], index: 7, kind: input, shape index: {}]   ;;  %s869_s8 = inlined_call_operand.vmem [shape: f32[8,4], index: 8, kind: output, shape index: {0}]   ;;  %s870_s9 = inlined_call_operand.hbm [shape: f32[1,32], index: 9, kind: output, shape index: {1}]   ;;  %s871_s10 = inlined_call_operand.hbm [shape: f32[1,32], index: 10, kind: output, shape index: {2}]  }
   0x1   :  { %v37_v0 = vld [vmem:[%s863_s2 + $0x18] sm:$0xff]  ;;  %v36_v1 = vld [vmem:[%s863_s2 + $0x10] sm:$0xff]  ;;  %v39_v2 = vld [vmem:[%s862_s1] sm:$0xf] }
   0x2   :  { %90 = vmatpush.msra.mxu1 %v37_v0  ;;  %588 = vmatpush.msk.msra.mxu0 %vm48_vm0, %v39_v2  ;;  %v38_v3 = vld [vmem:[%s861_s0] sm:$0xff]  ;;  %v35_v4 = vld [vmem:[%s863_s2 + $0x8] sm:$0xff] }
   0x3   :  { %589 = vmatmul.msk.f32.vlgmr.msra.gmra.mxu0 %vm44_vm1, %v38_v3  ;;  %141 = vmatpush.msra.mxu2 %v37_v0 }
   0x4   :  { %91 = vmatpush.msra.mxu1 %v36_v1  ;;  %194 = vmatpush.msra.mxu3 %v37_v0 }
   0x5   :  { %17 = vsyncpa [#allocation5], 0  ;;  %v34_v5 = vld [vmem:[%s863_s2] sm:$0xff]  ;;  %142 = vmatpush.msra.mxu2 %v36_v1  ;;  %247 = vmatpush.msrb.mxu0 %v37_v0  ;;  %vm74_vm2 = vcmask 261120   ;;  %s692_s28 = smov 32   ;;  %vm505_vm3 = vcmask 1040384  }
   0x6   :  { %92 = vmatpush.msra.mxu1 %v35_v4  ;;  %v72_v6 = vld [vmem:[%s867_s6] sm:$0x1]  ;;  %195 = vmatpush.msra.mxu3 %v36_v1  ;;  %s691_s6 = smov 64   ;;  %vm507_vm4 = vcmask 1041408   ;;  %vm509_vm5 = vcmask 1042432   ;;  %vm512_vm6 = vcmask 1044480  }
   0x7   :  { %143 = vmatpush.msra.mxu2 %v35_v4  ;;  %248 = vmatpush.msrb.mxu0 %v36_v1  ;;  %v604_v7 = vld [vmem:[%s864_s3] ss:$0 sm:$0xff]  ;;  %vm514_vm7 = vcmask 1045504   ;;  %s693_s3 = smov 96   ;;  %vm516_vm8 = vcmask 1046528   ;;  %vm498_vm9 = vcmask 261127  }
   0x8   :  { %93 = vmatpush.msra.mxu1 %v34_v5  ;;  %196 = vmatpush.msra.mxu3 %v35_v4  ;;  %v605_v13 = vld [vmem:[%s868_s7] ss:$0 sm:$0xff]  ;;  %s694_s16 = smov [#allocation4]   ;;  %s572_s19 = sshll.u32 %s871_s10, 4  ;;  %s573_s19 = int_to_ptr.hbm [resolvable:$true] %s572_s19 }
   0x9   :  { %590 = vmatmul.msk.f32.vlgmr.msra.gmra.mxu1 %vm74_vm2, %v72_v6  ;;  %144 = vmatpush.msra.mxu2 %v34_v5  ;;  %s570_s17 = sshll.u32 %s694_s16, 4  ;;  %s695_s20 = smov [#allocation2]   ;;  %s571_s17 = int_to_ptr.vmem [resolvable:$true] %s570_s17 }
   0xa   :  { %197 = vmatpush.msra.mxu3 %v34_v5  ;;  %249 = vmatpush.msrb.mxu0 %v35_v4  ;;  %s559_s21 = sshll.u32 %s695_s20, 4  ;;  %s561_s23 = sshll.u32 %s870_s9, 4  ;;  %s560_s21 = int_to_ptr.vmem [resolvable:$true] %s559_s21  ;;  %s562_s23 = int_to_ptr.hbm [resolvable:$true] %s561_s23 }
   0xb   :  { %300 = vmatpush.msrb.mxu1 %v37_v0  ;;  %353 = vmatpush.msrb.mxu2 %v37_v0 }
   0xc   :  { %250 = vmatpush.msrb.mxu0 %v34_v5  ;;  %406 = vmatpush.msrb.mxu3 %v37_v0 }
   0xd   :  { %301 = vmatpush.msrb.mxu1 %v36_v1  ;;  %354 = vmatpush.msrb.mxu2 %v36_v1 }
   0xe   :  { %407 = vmatpush.msrb.mxu3 %v36_v1  ;;  %459 = vmatpush.msra.mxu0 %v37_v0 }
   0xf   :  { %302 = vmatpush.msrb.mxu1 %v35_v4  ;;  %355 = vmatpush.msrb.mxu2 %v35_v4 }
  0x10   :  { %408 = vmatpush.msrb.mxu3 %v35_v4  ;;  %460 = vmatpush.msra.mxu0 %v36_v1 }
  0x11   :  { %303 = vmatpush.msrb.mxu1 %v34_v5  ;;  %356 = vmatpush.msrb.mxu2 %v34_v5 }
  0x12   :  { %409 = vmatpush.msrb.mxu3 %v34_v5  ;;  %461 = vmatpush.msra.mxu0 %v35_v4 }
  0x14   :  { %462 = vmatpush.msra.mxu0 %v34_v5 }
  0x80   :  { %v69_v8 = vpop.f32.mrf.mxu0 }
  0x81   :  { %v778_v9 = vadd.f32 %v604_v7, %v69_v8 }
  0x86   :  { %v95_v10 = vpop.f32.mrf.mxu1 }
  0x87   :  { %v98_v11 = vadd.f32 %v95_v10, %v778_v9 }
  0x89   :  { %607 = vtanh.f32 %v98_v11 }
  0x8f   :  { %v608_v12 = vpop.eup %607 }
  0x90   :  { %109 = vrot.lane.b32.xlu0 %v608_v12, %s691_s6  ;;  %v100_v14 = vmul.f32 0.5, %v608_v12 }
  0x92   :  { %v101_v15 = vadd.f32 0.5, %v100_v14 }
  0x98   :  { %104 = vrot.lane.b32.xlu0 %v605_v13, %s692_s28 }
 0x102   :  { %v110_v16 = vpop.permute.xlu0 %109 }
 0x103   :  { %v112_v17 = vmul.f32 %v110_v16, %v101_v15 }
 0x105   :  { %114 = vrot.lane.b32.xlu1 %v112_v17, %s692_s28 }
 0x10a   :  { %v105_v18 = vpop.permute.xlu0 %104 }
 0x10b   :  { %v107_v19 = vmul.f32 %v105_v18, %v101_v15 }
 0x177   :  { %v115_v20 = vpop.permute.xlu1 %114 }
 0x178   :  { %v117_v21 = vadd.f32 %v115_v20, %v107_v19 }
 0x17a   :  { %609 = vtanh.f32 %v117_v21  ;;  %v157_v34 = vrot.slane %v117_v21, 7 }
 0x180   :  { %v610_v22 = vpop.eup %609 }
 0x181   :  { %120 = vrot.lane.b32.xlu1 %v610_v22, %s691_s6 }
 0x1f3   :  { %v121_v23 = vpop.permute.xlu1 %120 }
 0x1f4   :  { %v123_v24 = vmul.f32 %v121_v23, %v101_v15 }
 0x1f6   :  { %125 = vrot.lane.b32.xlu2 %v123_v24, %s692_s28 }
 0x250   :  { %v126_v25 = vpop.permute.xlu2 %125 }
 0x251   :  { %591 = vmatmul.msk.f32.vlgmr.msra.gmra.mxu2 %vm74_vm2, %v126_v25 }
 0x2d4   :  { %v146_v26 = vpop.f32.mrf.mxu2 }
 0x2d5   :  { %v150_v27 = vrot.slane %v146_v26, 7 }
 0x2d7   :  { %v152_v28 = vadd.f32 %v150_v27, %v778_v9 }
 0x2d9   :  { %611 = vtanh.f32 %v152_v28 }
 0x2df   :  { %v612_v29 = vpop.eup %611 }
 0x2e0   :  { %161 = vrot.lane.b32.xlu2 %v612_v29, %s691_s6  ;;  %v154_v30 = vmul.f32 0.5, %v612_v29 }
 0x2e2   :  { %v155_v31 = vadd.f32 0.5, %v154_v30 }
 0x2e4   :  { %v159_v35 = vmul.f32 %v157_v34, %v155_v31 }
 0x33a   :  { %v162_v32 = vpop.permute.xlu2 %161 }
 0x33b   :  { %v164_v33 = vmul.f32 %v162_v32, %v155_v31 }
 0x33d   :  { %166 = vrot.lane.b32.xlu0 %v164_v33, %s692_s28 }
 0x3af   :  { %v167_v36 = vpop.permute.xlu0 %166 }
 0x3b0   :  { %v169_v37 = vadd.f32 %v167_v36, %v159_v35 }
 0x3b2   :  { %613 = vtanh.f32 %v169_v37  ;;  %v210_v51 = vrot.slane %v169_v37, 7 }
 0x3b8   :  { %v614_v38 = vpop.eup %613 }
 0x3b9   :  { %172 = vrot.lane.b32.xlu1 %v614_v38, %s691_s6 }
 0x42b   :  { %v173_v39 = vpop.permute.xlu1 %172 }
 0x42c   :  { %v175_v40 = vmul.f32 %v173_v39, %v155_v31 }
 0x42e   :  { %v177_v41 = vrot.slane %v175_v40, 1  ;;  %v506_v58 = vsel %vm505_vm3, %v123_v24, %v175_v40 }
 0x430   :  { %178 = vrot.lane.b32.xlu2 %v177_v41, %s692_s28 }
 0x48a   :  { %v179_v42 = vpop.permute.xlu2 %178 }
 0x48b   :  { %592 = vmatmul.msk.f32.vlgmr.msra.gmra.mxu3 %vm74_vm2, %v179_v42 }
 0x50e   :  { %v199_v43 = vpop.f32.mrf.mxu3 }
 0x50f   :  { %v203_v44 = vrot.slane %v199_v43, 6 }
 0x511   :  { %v205_v45 = vadd.f32 %v203_v44, %v778_v9 }
 0x513   :  { %615 = vtanh.f32 %v205_v45 }
 0x519   :  { %v616_v46 = vpop.eup %615 }
 0x51a   :  { %214 = vrot.lane.b32.xlu0 %v616_v46, %s691_s6  ;;  %v207_v47 = vmul.f32 0.5, %v616_v46 }
 0x51c   :  { %v208_v48 = vadd.f32 0.5, %v207_v47 }
 0x51e   :  { %v212_v52 = vmul.f32 %v210_v51, %v208_v48 }
 0x58c   :  { %v215_v49 = vpop.permute.xlu0 %214 }
 0x58d   :  { %v217_v50 = vmul.f32 %v215_v49, %v208_v48 }
 0x58f   :  { %219 = vrot.lane.b32.xlu1 %v217_v50, %s692_s28 }
 0x601   :  { %v220_v53 = vpop.permute.xlu1 %219 }
 0x602   :  { %v222_v54 = vadd.f32 %v220_v53, %v212_v52 }
 0x604   :  { %617 = vtanh.f32 %v222_v54  ;;  %v263_v6 = vrot.slane %v222_v54, 7 }
 0x60a   :  { %v618_v55 = vpop.eup %617 }
 0x60b   :  { %225 = vrot.lane.b32.xlu2 %v618_v55, %s691_s6 }
 0x665   :  { %v226_v56 = vpop.permute.xlu2 %225 }
 0x666   :  { %v228_v57 = vmul.f32 %v226_v56, %v208_v48 }
 0x668   :  { %v230_v59 = vrot.slane %v228_v57, 2  ;;  %v508_v60 = vsel %vm507_vm4, %v506_v58, %v228_v57 }
 0x66a   :  { %231 = vrot.lane.b32.xlu0 %v230_v59, %s692_s28 }
 0x6dc   :  { %v232_v61 = vpop.permute.xlu0 %231 }
 0x6dd   :  { %593 = vmatmul.msk.f32.vlgmr.msrb.gmra.mxu0 %vm74_vm2, %v232_v61 }
 0x75a   :  { %v252_v62 = vpop.f32.mrf.mxu0 }
 0x75b   :  { %v256_v63 = vrot.slane %v252_v62, 5 }
 0x75d   :  { %v258_v0 = vadd.f32 %v256_v63, %v778_v9 }
 0x75f   :  { %619 = vtanh.f32 %v258_v0 }
 0x765   :  { %v620_v1 = vpop.eup %619 }
 0x766   :  { %267 = vrot.lane.b32.xlu1 %v620_v1, %s691_s6  ;;  %v260_v2 = vmul.f32 0.5, %v620_v1 }
 0x768   :  { %v261_v3 = vadd.f32 0.5, %v260_v2 }
 0x76a   :  { %v265_v7 = vmul.f32 %v263_v6, %v261_v3 }
 0x7d8   :  { %v268_v4 = vpop.permute.xlu1 %267 }
 0x7d9   :  { %v270_v5 = vmul.f32 %v268_v4, %v261_v3 }
 0x7db   :  { %272 = vrot.lane.b32.xlu2 %v270_v5, %s692_s28 }
 0x835   :  { %v273_v8 = vpop.permute.xlu2 %272 }
 0x836   :  { %v275_v10 = vadd.f32 %v273_v8, %v265_v7 }
 0x838   :  { %621 = vtanh.f32 %v275_v10  ;;  %v316_v25 = vrot.slane %v275_v10, 7 }
 0x83e   :  { %v622_v11 = vpop.eup %621 }
 0x83f   :  { %278 = vrot.lane.b32.xlu0 %v622_v11, %s691_s6 }
 0x8b1   :  { %v279_v12 = vpop.permute.xlu0 %278 }
 0x8b2   :  { %v281_v13 = vmul.f32 %v279_v12, %v261_v3 }
 0x8b4   :  { %v283_v14 = vrot.slane %v281_v13, 3  ;;  %v510_v15 = vsel %vm509_vm5, %v508_v60, %v281_v13 }
 0x8b6   :  { %284 = vrot.lane.b32.xlu1 %v283_v14, %s692_s28 }
 0x928   :  { %v285_v16 = vpop.permute.xlu1 %284 }
 0x929   :  { %594 = vmatmul.msk.f32.vlgmr.msrb.gmra.mxu1 %vm74_vm2, %v285_v16 }
 0x9a6   :  { %v305_v17 = vpop.f32.mrf.mxu1 }
 0x9a7   :  { %v309_v18 = vrot.slane %v305_v17, 4 }
 0x9a9   :  { %v311_v19 = vadd.f32 %v309_v18, %v778_v9 }
 0x9ab   :  { %623 = vtanh.f32 %v311_v19 }
 0x9b1   :  { %v624_v20 = vpop.eup %623 }
 0x9b2   :  { %320 = vrot.lane.b32.xlu2 %v624_v20, %s691_s6  ;;  %v313_v21 = vmul.f32 0.5, %v624_v20 }
 0x9b4   :  { %v314_v22 = vadd.f32 0.5, %v313_v21  ;;  %v520_v21 = vld [vmem:[%s865_s4 + $0x10] sm:$0xff] }
 0x9b6   :  { %v318_v26 = vmul.f32 %v316_v25, %v314_v22 }
 0xa0c   :  { %v321_v23 = vpop.permute.xlu2 %320 }
 0xa0d   :  { %v323_v24 = vmul.f32 %v321_v23, %v314_v22  ;;  %v518_v23 = vld [vmem:[%s865_s4] sm:$0xff] }
 0xa0f   :  { %325 = vrot.lane.b32.xlu0 %v323_v24, %s692_s28 }
 0xa81   :  { %v326_v27 = vpop.permute.xlu0 %325 }
 0xa82   :  { %v328_v28 = vadd.f32 %v326_v27, %v318_v26 }
 0xa84   :  { %625 = vtanh.f32 %v328_v28  ;;  %v369_v43 = vrot.slane %v328_v28, 7 }
 0xa8a   :  { %v626_v29 = vpop.eup %625 }
 0xa8b   :  { %331 = vrot.lane.b32.xlu1 %v626_v29, %s691_s6 }
 0xafd   :  { %v332_v30 = vpop.permute.xlu1 %331 }
 0xafe   :  { %v334_v31 = vmul.f32 %v332_v30, %v314_v22  ;;  %v519_v22 = vld [vmem:[%s865_s4 + $0x8] sm:$0xff]  ;;  %v606_v30 = vld [vmem:[%s866_s5] ss:$0 sm:$0xff] }
 0xb00   :  { %v336_v32 = vrot.slane %v334_v31, 4  ;;  %v511_v33 = vsel %vm48_vm0, %v510_v15, %v334_v31 }
 0xb02   :  { %337 = vrot.lane.b32.xlu2 %v336_v32, %s692_s28 }
 0xb5c   :  { %v338_v34 = vpop.permute.xlu2 %337 }
 0xb5d   :  { %595 = vmatmul.msk.f32.vlgmr.msrb.gmra.mxu2 %vm74_vm2, %v338_v34 }
 0xbe0   :  { %v358_v35 = vpop.f32.mrf.mxu2 }
 0xbe1   :  { %v362_v36 = vrot.slane %v358_v35, 3 }
 0xbe3   :  { %v364_v37 = vadd.f32 %v362_v36, %v778_v9 }
 0xbe5   :  { %627 = vtanh.f32 %v364_v37 }
 0xbeb   :  { %v628_v38 = vpop.eup %627 }
 0xbec   :  { %373 = vrot.lane.b32.xlu0 %v628_v38, %s691_s6  ;;  %v366_v39 = vmul.f32 0.5, %v628_v38 }
 0xbee   :  { %v367_v40 = vadd.f32 0.5, %v366_v39 }
 0xbf0   :  { %v371_v44 = vmul.f32 %v369_v43, %v367_v40 }
 0xc5e   :  { %v374_v41 = vpop.permute.xlu0 %373 }
 0xc5f   :  { %v376_v42 = vmul.f32 %v374_v41, %v367_v40 }
 0xc61   :  { %378 = vrot.lane.b32.xlu1 %v376_v42, %s692_s28 }
 0xcd3   :  { %v379_v45 = vpop.permute.xlu1 %378 }
 0xcd4   :  { %v381_v46 = vadd.f32 %v379_v45, %v371_v44 }
 0xcd6   :  { %629 = vtanh.f32 %v381_v46  ;;  %v422_v61 = vrot.slane %v381_v46, 7 }
 0xcdc   :  { %v630_v47 = vpop.eup %629 }
 0xcdd   :  { %384 = vrot.lane.b32.xlu2 %v630_v47, %s691_s6 }
 0xd37   :  { %v385_v48 = vpop.permute.xlu2 %384 }
 0xd38   :  { %v387_v49 = vmul.f32 %v385_v48, %v367_v40 }
 0xd3a   :  { %v389_v50 = vrot.slane %v387_v49, 5  ;;  %v513_v51 = vsel %vm512_vm6, %v511_v33, %v387_v49 }
 0xd3c   :  { %390 = vrot.lane.b32.xlu0 %v389_v50, %s692_s28 }
 0xdae   :  { %v391_v52 = vpop.permute.xlu0 %390 }
 0xdaf   :  { %596 = vmatmul.msk.f32.vlgmr.msrb.gmra.mxu3 %vm74_vm2, %v391_v52 }
 0xe32   :  { %v411_v53 = vpop.f32.mrf.mxu3 }
 0xe33   :  { %v415_v54 = vrot.slane %v411_v53, 2 }
 0xe35   :  { %v417_v55 = vadd.f32 %v415_v54, %v778_v9 }
 0xe37   :  { %631 = vtanh.f32 %v417_v55 }
 0xe3d   :  { %v632_v56 = vpop.eup %631 }
 0xe3e   :  { %426 = vrot.lane.b32.xlu1 %v632_v56, %s691_s6  ;;  %v419_v57 = vmul.f32 0.5, %v632_v56 }
 0xe40   :  { %v420_v58 = vadd.f32 0.5, %v419_v57 }
 0xe42   :  { %v424_v62 = vmul.f32 %v422_v61, %v420_v58 }
 0xeb0   :  { %v427_v59 = vpop.permute.xlu1 %426 }
 0xeb1   :  { %v429_v60 = vmul.f32 %v427_v59, %v420_v58 }
 0xeb3   :  { %431 = vrot.lane.b32.xlu2 %v429_v60, %s692_s28 }
 0xf0d   :  { %v432_v63 = vpop.permute.xlu2 %431 }
 0xf0e   :  { %v434_v0 = vadd.f32 %v432_v63, %v424_v62 }
 0xf10   :  { %633 = vtanh.f32 %v434_v0  ;;  %v475_v16 = vrot.slane %v434_v0, 7 }
 0xf16   :  { %v634_v1 = vpop.eup %633 }
 0xf17   :  { %437 = vrot.lane.b32.xlu0 %v634_v1, %s691_s6 }
 0xf89   :  { %v438_v2 = vpop.permute.xlu0 %437 }
 0xf8a   :  { %v440_v3 = vmul.f32 %v438_v2, %v420_v58 }
 0xf8c   :  { %v442_v4 = vrot.slane %v440_v3, 6  ;;  %v515_v5 = vsel %vm514_vm7, %v513_v51, %v440_v3 }
 0xf8e   :  { %443 = vrot.lane.b32.xlu1 %v442_v4, %s692_s28 }
0x1000   :  { %v444_v6 = vpop.permute.xlu1 %443 }
0x1001   :  { %597 = vmatmul.msk.f32.vlgmr.msra.gmra.mxu0 %vm74_vm2, %v444_v6 }
0x107e   :  { %v464_v7 = vpop.f32.mrf.mxu0 }
0x107f   :  { %v468_v8 = vrot.slane %v464_v7, 1 }
0x1081   :  { %v470_v10 = vadd.f32 %v468_v8, %v778_v9  ;;  %v521_v9 = vld [vmem:[%s865_s4 + $0x18] sm:$0xff] }
0x1082   :  { %543 = vmatpush.msra.mxu1 %v521_v9 }
0x1083   :  { %635 = vtanh.f32 %v470_v10 }
0x1084   :  { %544 = vmatpush.msra.mxu1 %v520_v21 }
0x1086   :  { %545 = vmatpush.msra.mxu1 %v519_v22 }
0x1088   :  { %546 = vmatpush.msra.mxu1 %v518_v23 }
0x1089   :  { %v636_v11 = vpop.eup %635 }
0x108a   :  { %479 = vrot.lane.b32.xlu2 %v636_v11, %s691_s6  ;;  %v472_v12 = vmul.f32 0.5, %v636_v11 }
0x108c   :  { %v473_v13 = vadd.f32 0.5, %v472_v12 }
0x108e   :  { %v477_v17 = vmul.f32 %v475_v16, %v473_v13 }
0x10e4   :  { %v480_v14 = vpop.permute.xlu2 %479 }
0x10e5   :  { %v482_v15 = vmul.f32 %v480_v14, %v473_v13 }
0x10e7   :  { %484 = vrot.lane.b32.xlu0 %v482_v15, %s692_s28 }
0x1159   :  { %v485_v18 = vpop.permute.xlu0 %484 }
0x115a   :  { %v487_v19 = vadd.f32 %v485_v18, %v477_v17 }
0x115c   :  { %637 = vtanh.f32 %v487_v19 }
0x1162   :  { %v638_v20 = vpop.eup %637 }
0x1163   :  { %490 = vrot.lane.b32.xlu1 %v638_v20, %s691_s6 }
0x116b   :  { %501 = vrot.lane.b32.xlu1 %v487_v19, %s693_s3 }
0x11d5   :  { %v491_v24 = vpop.permute.xlu1 %490 }
0x11d6   :  { %v493_v25 = vmul.f32 %v491_v24, %v473_v13 }
0x11d8   :  { %495 = vrot.lane.b32.xlu0 %v493_v25, %s692_s28  ;;  %v517_v26 = vsel %vm516_vm8, %v515_v5, %v493_v25 }
0x11d9   :  { %527 = vrot.lane.b32.xlu2 %v517_v26, %s692_s28 }
0x11dd   :  { %v502_v27 = vpop.permute.xlu1 %501 }
0x11de   :  { %504 = vst.msk [vmem:[#allocation4 - $0x7] sm:$0x80] %vm498_vm9, %v502_v27 }
0x11df   :  { %575 = dma.vmem_to_hbm [thread:$0]  %s571_s17, 16, %s573_s19, [#allocation5]  }
0x1233   :  { %v528_v28 = vpop.permute.xlu2 %527 }
0x1234   :  { %598 = vmatmul.msk.f32.vlgmr.msra.gmra.mxu1 %vm74_vm2, %v528_v28 }
0x124a   :  { %v496_v29 = vpop.permute.xlu0 %495 }
0x124b   :  { %499 = vst.msk [vmem:[#allocation2 - $0x7] sm:$0x80] %vm498_vm9, %v496_v29 }
0x124c   :  { %564 = dma.vmem_to_hbm [thread:$0]  %s560_s21, 16, %s562_s23, [#allocation3]  }
0x12b1   :  { %v548_v31 = vpop.f32.mrf.mxu1 }
0x12b2   :  { %v549_v32 = vadd.f32 %v606_v30, %v548_v31 }
0x12b4   :  { %551 = vst.msk [vmem:[%s869_s8] sm:$0xff] %vm44_vm1, %v549_v32 }
0x12b5   :  { %687 = dma.done.wait [#allocation3], 16  }
0x12b6   :  { %688 = vsyncadd [#allocation3], 4294967280 }
0x12b7   :  { %689 = dma.done.wait [#allocation5], 16  }
0x12b8   :  { %690 = vsyncadd [#allocation5], 4294967280 }
0x12b9   :  { %586 = vsyncpa [#allocation3], 1 }
0x12ba   :  { %587 = vsyncpa [#allocation5], 1 }

</bundles_post_ra>
